<compile_context>
chip_gen: v5e
topology: v5e:2x2
jax: 0.10.0
libtpu: 0.0.40
codegen_flags: <defaults>
</compile_context>

<pallas_src>
import jax
import jax.numpy as jnp
from jax.experimental import pallas as pl
from jax.experimental.pallas import tpu as pltpu

OBS_DIM = 11   # MPE listener observation: vel(2) + rel. landmarks(6) + comm(3)
LST_DIM = 2    # listener_out gives the (x, y) target position


def planner_kernel(obs_ref, lst_ref, goal_ref, xd_ref, xi_ref):
    obs = obs_ref[...]                         # (B, 11) f32
    lst = lst_ref[...]                         # (B, 2)  f32
    zeros2 = jnp.zeros_like(lst)               # (B, 2)

    # goal_comm = obs[:, 8:11]
    goal_ref[...] = obs[:, 8:11]

    # xd = cat(listener_out, zeros(B, 2))
    xd_ref[...] = jnp.concatenate([lst, zeros2], axis=-1)

    # x_init = cat(zeros(B, 2), obs[:, :2])
    xi_ref[...] = jnp.concatenate([zeros2, obs[:, 0:2]], axis=-1)


def planner_forward(obs, listener_out):
    """Returns (obs[:, 8:11], xd, x_init) exactly like Planner.forward."""
    B, D = obs.shape
    assert D == OBS_DIM, "obs must have 11 features"
    assert listener_out.shape == (B, LST_DIM)

    obs = obs.astype(jnp.float32)
    lst = listener_out.astype(jnp.float32)

    bytes_accessed = 4 * B * (OBS_DIM + LST_DIM + 3 + 4 + 4)

    return pl.pallas_call(
        planner_kernel,
        out_shape=(
            jax.ShapeDtypeStruct((B, 3), jnp.float32),
            jax.ShapeDtypeStruct((B, 4), jnp.float32),
            jax.ShapeDtypeStruct((B, 4), jnp.float32),
        ),
        in_specs=[
            pl.BlockSpec(memory_space=pltpu.MemorySpace.VMEM),
            pl.BlockSpec(memory_space=pltpu.MemorySpace.VMEM),
        ],
        out_specs=(
            pl.BlockSpec(memory_space=pltpu.MemorySpace.VMEM),
            pl.BlockSpec(memory_space=pltpu.MemorySpace.VMEM),
            pl.BlockSpec(memory_space=pltpu.MemorySpace.VMEM),
        ),
        cost_estimate=pl.CostEstimate(
            flops=0, transcendentals=0, bytes_accessed=bytes_accessed),
    )(obs, lst)


if __name__ == "__main__":
    key = jax.random.PRNGKey(0)
    k1, k2 = jax.random.split(key)
    batch = 2
    obs = jax.random.normal(k1, (batch, OBS_DIM), dtype=jnp.float32)
    listener_out = jax.random.normal(k2, (batch, LST_DIM), dtype=jnp.float32)

    goal, xd, x_init = jax.block_until_ready(planner_forward(obs, listener_out))

    # Pure-JAX reference (mirrors the PyTorch forward exactly).
    ref_goal = obs[:, 8:11]
    ref_xd = jnp.concatenate(
        [listener_out, jnp.zeros((batch, 2), jnp.float32)], axis=-1)
    ref_xi = jnp.concatenate(
        [jnp.zeros((batch, 2), jnp.float32), obs[:, :2]], axis=-1)

    assert goal.shape == (batch, 3)
    assert xd.shape == (batch, 4)
    assert x_init.shape == (batch, 4)
    assert bool(jnp.allclose(goal, ref_goal, atol=1e-6))
    assert bool(jnp.allclose(xd, ref_xd, atol=1e-6))
    assert bool(jnp.allclose(x_init, ref_xi, atol=1e-6))
    print("KERNEL_OK")
</pallas_src>

<mosaic_0001>
module attributes {stable_mosaic.version = 11 : i64} {
  func.func @planner_kernel(%arg0: memref<2x11xf32, #tpu.memory_space<vmem>>, %arg1: memref<2x2xf32, #tpu.memory_space<vmem>>, %arg2: memref<2x3xf32, #tpu.memory_space<vmem>>, %arg3: memref<2x4xf32, #tpu.memory_space<vmem>>, %arg4: memref<2x4xf32, #tpu.memory_space<vmem>>) attributes {dimension_semantics = [], scalar_prefetch = 0 : i64, scratch_operands = 0 : i64, tpu.core_type = #tpu.core_type<tc>} {
    %c0 = arith.constant 0 : index
    %c0_0 = arith.constant 0 : index
    %0 = vector.load %arg0[%c0, %c0_0] : memref<2x11xf32, #tpu.memory_space<vmem>>, vector<2x11xf32>
    %c0_1 = arith.constant 0 : index
    %c0_2 = arith.constant 0 : index
    %1 = vector.load %arg1[%c0_1, %c0_2] : memref<2x2xf32, #tpu.memory_space<vmem>>, vector<2x2xf32>
    %cst = arith.constant 0.000000e+00 : f32
    %2 = vector.broadcast %cst : f32 to vector<2x2xf32>
    %3 = vector.extract_strided_slice %0 {offsets = [0, 8], sizes = [2, 3], strides = [1, 1]} : vector<2x11xf32> to vector<2x3xf32>
    %c0_3 = arith.constant 0 : index
    %c0_4 = arith.constant 0 : index
    %4 = vector.load %arg2[%c0_3, %c0_4] : memref<2x3xf32, #tpu.memory_space<vmem>>, vector<2x3xf32>
    tpu.vector_store %arg2[%c0_3, %c0_4], %3 {strides = array<i32>} : memref<2x3xf32, #tpu.memory_space<vmem>>, vector<2x3xf32>,
    %5 = tpu.concatenate %1, %2 in 1 : vector<2x2xf32>, vector<2x2xf32> -> vector<2x4xf32>
    %c0_5 = arith.constant 0 : index
    %c0_6 = arith.constant 0 : index
    %6 = vector.load %arg3[%c0_5, %c0_6] : memref<2x4xf32, #tpu.memory_space<vmem>>, vector<2x4xf32>
    tpu.vector_store %arg3[%c0_5, %c0_6], %5 {strides = array<i32>} : memref<2x4xf32, #tpu.memory_space<vmem>>, vector<2x4xf32>,
    %7 = vector.extract_strided_slice %0 {offsets = [0, 0], sizes = [2, 2], strides = [1, 1]} : vector<2x11xf32> to vector<2x2xf32>
    %8 = tpu.concatenate %2, %7 in 1 : vector<2x2xf32>, vector<2x2xf32> -> vector<2x4xf32>
    %c0_7 = arith.constant 0 : index
    %c0_8 = arith.constant 0 : index
    %9 = vector.load %arg4[%c0_7, %c0_8] : memref<2x4xf32, #tpu.memory_space<vmem>>, vector<2x4xf32>
    tpu.vector_store %arg4[%c0_7, %c0_8], %8 {strides = array<i32>} : memref<2x4xf32, #tpu.memory_space<vmem>>, vector<2x4xf32>,
    return
  }
}

</mosaic_0001>

<bundles_post_ra>
// kernel: tpu_custom_call.1
= control target key start
LH: loop header
LB: loop body
LE: loop exit
PB: predicated region body
PF: predicated region fallthrough
CT: control target
= control target key end

     0   :  { %10 = vsyncpa [#allocation3], 0  ;;  %s294_s0 = inlined_call_operand.hbm [shape: f32[2,11], index: 0, kind: input, shape index: {}]   ;;  %s295_s1 = inlined_call_operand.hbm [shape: f32[2,2], index: 1, kind: input, shape index: {}]   ;;  %s296_s2 = inlined_call_operand.hbm [shape: f32[2,3], index: 2, kind: output, shape index: {0}]   ;;  %s297_s3 = inlined_call_operand.hbm [shape: f32[2,4], index: 3, kind: output, shape index: {1}]   ;;  %s298_s4 = inlined_call_operand.hbm [shape: f32[2,4], index: 4, kind: output, shape index: {2}]  }
   0x1   :  { %11 = vsyncpa [#allocation6], 0 }
   0x2   :  { %12 = vsyncpa [#allocation4], 0 }
   0x3   :  { %13 = vsyncpa [#allocation9], 0  ;;  %s19_s17 = sshll.u32 %s294_s0, 4  ;;  %s245_s18 = smov [#allocation2]   ;;  %s20_s17 = int_to_ptr.hbm [resolvable:$true] %s19_s17 }
   0x4   :  { %s21_s19 = sshll.u32 %s245_s18, 4  ;;  %s30_s22 = sshll.u32 %s295_s1, 4  ;;  %s22_s19 = int_to_ptr.vmem [resolvable:$true] %s21_s19  ;;  %s31_s22 = int_to_ptr.hbm [resolvable:$true] %s30_s22 }
   0x5   :  { %24 = dma.hbm_to_vmem [thread:$0]  %s20_s17, 32, %s22_s19, [#allocation3]  }
   0x6   :  { %s246_s23 = smov [#allocation5]  }
   0x7   :  { %s32_s24 = sshll.u32 %s246_s23, 4  ;;  %s33_s24 = int_to_ptr.vmem [resolvable:$true] %s32_s24 }
   0x8   :  { %35 = dma.hbm_to_vmem [thread:$0]  %s31_s22, 32, %s33_s24, [#allocation6]  }
   0x9   :  { %237 = dma.done.wait [#allocation3], 32  }
   0xa   :  { %238 = vsyncadd [#allocation3], 4294967264 }
   0xb   :  { %239 = dma.done.wait [#allocation6], 32  }
   0xc   :  { %240 = vsyncadd [#allocation6], 4294967264  ;;  %s247_s25 = smov [#allocation8]   ;;  %s79_s28 = sshll.u32 %s297_s3, 4  ;;  %v44_v0 = vld [vmem:[#allocation2] sm:$0x3]  ;;  %s80_s28 = int_to_ptr.hbm [resolvable:$true] %s79_s28 }
   0xd   :  { %s77_s0 = sshll.u32 %s247_s25, 4  ;;  %v45_v1 = vld [vmem:[#allocation5] sm:$0x3]  ;;  %vm52_vm0 = vcmask 15360   ;;  %s248_s1 = smov 2   ;;  %vm54_vm1 = vcmask 25600   ;;  %s78_s0 = int_to_ptr.vmem [resolvable:$true] %s77_s0 }
   0xe   :  { %56 = vrot.lane.b32.xlu0 %v44_v0, %s248_s1  ;;  %v53_v2 = vsel %vm52_vm0, %v45_v1, 0.0  ;;  %s249_s29 = smov 120   ;;  %s250_s30 = smov [#allocation10]   ;;  %vm50_vm2 = vcmask 17408  }
   0xf   :  { %55 = vst.msk [vmem:[#allocation8] sm:$0x3] %vm54_vm1, %v53_v2  ;;  %s88_s5 = sshll.u32 %s250_s30, 4  ;;  %s90_s3 = sshll.u32 %s298_s4, 4  ;;  %s89_s5 = int_to_ptr.vmem [resolvable:$true] %s88_s5  ;;  %s91_s3 = int_to_ptr.hbm [resolvable:$true] %s90_s3 }
  0x10   :  { %82 = dma.vmem_to_hbm [thread:$0]  %s78_s0, 32, %s80_s28, [#allocation9]  }
  0x11   :  { %s251_s8 = smov [#allocation7]   ;;  %s68_s12 = sshll.u32 %s296_s2, 4  ;;  %s69_s12 = int_to_ptr.hbm [resolvable:$true] %s68_s12 }
  0x12   :  { %s66_s9 = sshll.u32 %s251_s8, 4  ;;  %s67_s9 = int_to_ptr.vmem [resolvable:$true] %s66_s9 }
  0x16   :  { %47 = vrot.lane.b32.xlu0 %v44_v0, %s249_s29 }
  0x80   :  { %v57_v3 = vpop.permute.xlu0 %56 }
  0x81   :  { %v59_v4 = vsel %vm52_vm0, 0.0, %v57_v3 }
  0x82   :  { %60 = vst.msk [vmem:[#allocation10] sm:$0x3] %vm54_vm1, %v59_v4 }
  0x83   :  { %93 = dma.vmem_to_hbm [thread:$0]  %s89_s5, 32, %s91_s3, [#allocation9]  }
  0x88   :  { %v48_v5 = vpop.permute.xlu0 %47 }
  0x89   :  { %51 = vst.msk [vmem:[#allocation7] sm:$0x3] %vm50_vm2, %v48_v5 }
  0x8a   :  { %71 = dma.vmem_to_hbm [thread:$0]  %s67_s9, 32, %s69_s12, [#allocation4]  }
  0x8b   :  { %241 = dma.done.wait [#allocation4], 32  }
  0x8c   :  { %242 = vsyncadd [#allocation4], 4294967264 }
  0x8d   :  { %243 = dma.done.wait [#allocation9], 64  }
  0x8e   :  { %244 = vsyncadd [#allocation9], 4294967232 }
  0x8f   :  { %106 = vsyncpa [#allocation3], 1 }
  0x90   :  { %107 = vsyncpa [#allocation6], 1 }
  0x91   :  { %108 = vsyncpa [#allocation4], 1 }
  0x92   :  { %109 = vsyncpa [#allocation9], 1 }

</bundles_post_ra>
